<compile_context>
chip_gen: v7x
topology: tpu7x:2x2x1
jax: 0.10.0
libtpu: 0.0.40
codegen_flags: <defaults>
</compile_context>

<pallas_src>
import jax
import jax.numpy as jnp
from jax.experimental import pallas as pl
from jax.experimental.pallas import tpu as pltpu


def _round_up(x: int, m: int) -> int:
    return ((x + m - 1) // m) * m


# ----------------------------------------------------------------------------
# Pallas kernel: fused Jodie interaction step for one (batch tile, P tile)
# ----------------------------------------------------------------------------
def _jodie_step_kernel(
    # activations (per batch tile)
    prev_ui_ref,   # (TB, 2E)  [prev_user | prev_item]                (bf16)
    udelta_ref,    # (TB, 1)   user time delta                         (f32)
    idelta_ref,    # (TB, 1)   item time delta                         (f32)
    pred_add_ref,  # (TB, TP)  wp_uh[uid] + wp_ih[iid] + b_pred        (bf16)
    # weights (replicated / P-tiled)
    wtbt_ref,      # (2, 2E)   row0 = [wt | 0], row1 = [bt | 0]        (f32)
    w_pred_ref,    # (2E, TP)  [wp_proj; wp_pi] tile                   (bf16)
    w_rnn_ref,     # (2E, 2E)  [[wu_a, wi_b],[wu_b, wi_a]]             (bf16)
    wdelta_ref,    # (2, 2E)   row0 = [wu_d | 0], row1 = [0 | wi_d]    (f32)
    b_rnn_ref,     # (1, 2E)   [bu | bi]                               (f32)
    # outputs
    pred_ref,      # (TB, TP)  predicted item embeddings tile          (f32)
    rnn_ref,       # (TB, 2E)  [new_user_emb | new_item_emb]           (f32)
):
    prev_ui = prev_ui_ref[...]                    # (TB, 2E) bf16
    udelta = udelta_ref[...]                      # (TB, 1)  f32
    idelta = idelta_ref[...]                      # (TB, 1)  f32

    # embedding_projection, lane-dense: the item half of wt/bt is zero so
    # (1 + time_ctx) * prev_ui == [ (1 + tc) * prev_u | prev_i ]  (no concat).
    time_ctx = udelta * wtbt_ref[0:1, :] + wtbt_ref[1:2, :]          # (TB, 2E)
    pred_in = ((1.0 + time_ctx) * prev_ui).astype(jnp.bfloat16)

    # prediction_layer tile: one (TB,2E)@(2E,TP) MXU contraction + the
    # pre-summed gathered long-term rows (+ bias, folded in the wrapper).
    pred = jnp.dot(pred_in, w_pred_ref[...], preferred_element_type=jnp.float32)
    pred_ref[...] = pred + pred_add_ref[...].astype(jnp.float32)

    # embedding_update: independent of the P tile -> compute once per batch
    # tile; rnn output block stays resident across the "arbitrary" P axis.
    @pl.when(pl.program_id(1) == 0)
    def _():
        rnn_acc = jnp.dot(prev_ui, w_rnn_ref[...],
                          preferred_element_type=jnp.float32)        # (TB, 2E)
        delta_term = udelta * wdelta_ref[0:1, :] + idelta * wdelta_ref[1:2, :]
        rnn_ref[...] = jax.nn.sigmoid(rnn_acc + delta_term + b_rnn_ref[...])


# ----------------------------------------------------------------------------
# Wrapper: gather/scatter glue + pallas_call (jit with memory donation below)
# ----------------------------------------------------------------------------
def jodie_forward_edge_sequence(kparams, user_memory, item_memory,
                                user_ids, user_features, item_ids, item_features):
    """Functional equivalent of Jodie.forward_edge_sequence (one edge step).

    Returns:
      (new_user_emb, prev_user_emb, new_item_emb, predicted_item_emb, prev_item_emb),
      new_user_memory, new_item_memory
    """
    B = user_ids.shape[0]
    _, U, E = user_memory.shape
    I = item_memory.shape[1]
    P = I + E

    arange = jnp.arange(B)
    prev_u = user_memory[arange, user_ids, :].astype(jnp.float32)     # (B, E)
    prev_i = item_memory[arange, item_ids, :].astype(jnp.float32)     # (B, E)

    udelta = user_features[:, 0:1].astype(jnp.float32)                # (B, 1)
    idelta = item_features[:, 0:1].astype(jnp.float32)                # (B, 1)

    # Lane-dense activation slab, bf16 (halves HBM bytes; the fp32 copies
    # above are what the module returns).
    prev_ui = jnp.concatenate([prev_u, prev_i], axis=-1).astype(jnp.bfloat16)

    # one_hot(id) @ W == W[id]; mode="fill" keeps the "OOB id -> zero row"
    # semantics of one_hot. Both gathers + prediction bias pre-summed into a
    # single bf16 (B, P) stream.
    uh_rows = jnp.take(kparams["wp_uh"], user_ids, axis=0,
                       mode="fill", fill_value=0.0)                    # (B, P)
    ih_rows = jnp.take(kparams["wp_ih"], item_ids, axis=0,
                       mode="fill", fill_value=0.0)                    # (B, P)
    pred_add = (uh_rows + ih_rows + kparams["b_pred"]).astype(jnp.bfloat16)

    # Batch tiling at 8-row (f32 sublane) granularity; >= 2 tiles when B >= 16
    # so the "parallel" batch axis can shard across v7x's 2 TensorCores.
    if B >= 16:
        TB = min(256, _round_up((B + 1) // 2, 8))
    else:
        TB = _round_up(B, 8)
    B_pad = _round_up(B, TB)
    nb = B_pad // TB

    if B_pad != B:
        pad = ((0, B_pad - B), (0, 0))
        prev_ui = jnp.pad(prev_ui, pad)
        udelta = jnp.pad(udelta, pad)
        idelta = jnp.pad(idelta, pad)
        pred_add = jnp.pad(pred_add, pad)

    # P tiling: largest lane-aligned tile <= 512 dividing P (or the whole row).
    if P <= 512:
        TP = P
    elif P % 512 == 0:
        TP = 512
    elif P % 256 == 0:
        TP = 256
    elif P % 128 == 0:
        TP = 128
    else:
        TP = P
    np_tiles = P // TP

    acts = [prev_ui, udelta, idelta, pred_add]
    weights = [kparams["wtbt"], kparams["w_pred"], kparams["w_rnn"],
               kparams["wdelta"], kparams["b_rnn"]]

    in_specs = [
        pl.BlockSpec((TB, 2 * E), lambda i, j: (i, 0)),      # prev_ui
        pl.BlockSpec((TB, 1), lambda i, j: (i, 0)),          # udelta
        pl.BlockSpec((TB, 1), lambda i, j: (i, 0)),          # idelta
        pl.BlockSpec((TB, TP), lambda i, j: (i, j)),         # pred_add
        pl.BlockSpec((2, 2 * E), lambda i, j: (0, 0)),       # wtbt
        pl.BlockSpec((2 * E, TP), lambda i, j: (0, j)),      # w_pred
        pl.BlockSpec((2 * E, 2 * E), lambda i, j: (0, 0)),   # w_rnn
        pl.BlockSpec((2, 2 * E), lambda i, j: (0, 0)),       # wdelta
        pl.BlockSpec((1, 2 * E), lambda i, j: (0, 0)),       # b_rnn
    ]
    out_specs = (
        pl.BlockSpec((TB, TP), lambda i, j: (i, j)),         # pred
        pl.BlockSpec((TB, 2 * E), lambda i, j: (i, 0)),      # [newu | newi]
    )

    flops = 2 * B_pad * (2 * E) * (P + 2 * E) + 16 * B_pad * E
    bytes_in = sum(int(x.size) * x.dtype.itemsize for x in acts + weights)
    bytes_out = B_pad * (P + 2 * E) * 4
    cost = pl.CostEstimate(flops=flops, transcendentals=2 * B_pad * E,
                           bytes_accessed=bytes_in + bytes_out)

    pred, rnn_out = pl.pallas_call(
        _jodie_step_kernel,
        grid=(nb, np_tiles),
        out_shape=(jax.ShapeDtypeStruct((B_pad, P), jnp.float32),
                   jax.ShapeDtypeStruct((B_pad, 2 * E), jnp.float32)),
        in_specs=in_specs,
        out_specs=out_specs,
        compiler_params=pltpu.CompilerParams(
            dimension_semantics=("parallel", "arbitrary"),
            vmem_limit_bytes=32 * 1024 * 1024),
        cost_estimate=cost,
    )(*acts, *weights)

    pred = pred[:B]
    newu = rnn_out[:B, :E]
    newi = rnn_out[:B, E:]

    # Scatter back into the (donated) memory tensors -> in-place update slice.
    new_user_memory = user_memory.at[arange, user_ids, :].set(newu)
    new_item_memory = item_memory.at[arange, item_ids, :].set(newi)

    return (newu, prev_u, newi, pred, prev_i), new_user_memory, new_item_memory


# Memory tensors donated so XLA updates them in place (no full HBM copy/step).
jodie_step = jax.jit(jodie_forward_edge_sequence, donate_argnums=(1, 2))


# ----------------------------------------------------------------------------
# Parameters: PyTorch-layout init (weights pre-transposed to (in, out)),
# then packed / zero-padded / stacked ONCE for the kernel.
# ----------------------------------------------------------------------------
def init_params(key, embedding_size, nb_users, nb_items):
    E, U, I = embedding_size, nb_users, nb_items
    P = I + E
    shapes = {
        "wt": (1, E), "bt": (1, E),
        "wp_proj": (E, P), "wp_uh": (U, P), "wp_pi": (E, P), "wp_ih": (I, P), "bp": (1, P),
        "wu_a": (E, E), "wu_b": (E, E), "wu_d": (1, E), "bu": (1, E),
        "wi_a": (E, E), "wi_b": (E, E), "wi_d": (1, E), "bi": (1, E),
    }
    params = {}
    for name, shape in shapes.items():
        key, sub = jax.random.split(key)
        params[name] = (0.1 * jax.random.normal(sub, shape)).astype(jnp.float32)
    return params


def pack_params(p):
    """Stack / zero-pad / cast the PyTorch-layout params into kernel layout."""
    E = p["wt"].shape[1]
    z = jnp.zeros((1, E), jnp.float32)
    wt_pad = jnp.concatenate([p["wt"], z], axis=-1)       # (1, 2E)
    bt_pad = jnp.concatenate([p["bt"], z], axis=-1)       # (1, 2E)
    wud_pad = jnp.concatenate([p["wu_d"], z], axis=-1)    # (1, 2E)
    wid_pad = jnp.concatenate([z, p["wi_d"]], axis=-1)    # (1, 2E)
    return {
        # time-context weight/bias, item half zeroed (lane-dense projection)
        "wtbt": jnp.concatenate([wt_pad, bt_pad], axis=0),        # (2, 2E)
        # user/item delta weights for the RNNs, padded to 2E
        "wdelta": jnp.concatenate([wud_pad, wid_pad], axis=0),    # (2, 2E)
        # prediction: [user_proj | prev_i] contraction weights (bf16 for MXU)
        "w_pred": jnp.concatenate([p["wp_proj"], p["wp_pi"]], axis=0).astype(jnp.bfloat16),
        "b_pred": p["bp"],                                        # folded into pred_add
        # long-term one-hot weights kept fp32; only gathered rows enter VMEM
        "wp_uh": p["wp_uh"], "wp_ih": p["wp_ih"],
        # both RNNs as one block matrix: [prev_u|prev_i] @ W -> [user_pre|item_pre]
        "w_rnn": jnp.block([[p["wu_a"], p["wi_b"]],
                            [p["wu_b"], p["wi_a"]]]).astype(jnp.bfloat16),
        "b_rnn": jnp.concatenate([p["bu"], p["bi"]], axis=-1),    # (1, 2E)
    }


# ----------------------------------------------------------------------------
# References for verification
# ----------------------------------------------------------------------------
def reference_packed(kp, user_memory, item_memory,
                     user_ids, user_features, item_ids, item_features):
    """Plain-JAX mirror of the kernel math (same bf16 casts) -> tight check."""
    B = user_ids.shape[0]
    arange = jnp.arange(B)
    prev_u = user_memory[arange, user_ids, :].astype(jnp.float32)
    prev_i = item_memory[arange, item_ids, :].astype(jnp.float32)
    ud = user_features[:, 0:1].astype(jnp.float32)
    idel = item_features[:, 0:1].astype(jnp.float32)
    prev_ui = jnp.concatenate([prev_u, prev_i], axis=-1).astype(jnp.bfloat16)
    uh = jnp.take(kp["wp_uh"], user_ids, axis=0, mode="fill", fill_value=0.0)
    ih = jnp.take(kp["wp_ih"], item_ids, axis=0, mode="fill", fill_value=0.0)
    pred_add = (uh + ih + kp["b_pred"]).astype(jnp.bfloat16)

    tc = ud * kp["wtbt"][0:1] + kp["wtbt"][1:2]
    pred_in = ((1.0 + tc) * prev_ui).astype(jnp.bfloat16)
    pred = jnp.dot(pred_in, kp["w_pred"], preferred_element_type=jnp.float32)
    pred = pred + pred_add.astype(jnp.float32)

    rnn = jnp.dot(prev_ui, kp["w_rnn"], preferred_element_type=jnp.float32)
    rnn = rnn + ud * kp["wdelta"][0:1] + idel * kp["wdelta"][1:2]
    rnn = jax.nn.sigmoid(rnn + kp["b_rnn"])
    E = prev_u.shape[1]
    return rnn[:, :E], prev_u, rnn[:, E:], pred, prev_i


def reference_torch_fp32(p, user_memory, item_memory,
                         user_ids, user_features, item_ids, item_features):
    """Exact fp32 mirror of the PyTorch forward (loose check vs bf16 kernel)."""
    B = user_ids.shape[0]
    U = user_memory.shape[1]
    I = item_memory.shape[1]
    arange = jnp.arange(B)
    prev_u = user_memory[arange, user_ids, :]
    prev_i = item_memory[arange, item_ids, :]
    ud = user_features[:, 0:1].astype(jnp.float32)
    idel = item_features[:, 0:1].astype(jnp.float32)
    uhot = jax.nn.one_hot(user_ids, U, dtype=jnp.float32)
    ihot = jax.nn.one_hot(item_ids, I, dtype=jnp.float32)

    tc = ud @ p["wt"] + p["bt"]
    proj = (1.0 + tc) * prev_u
    pred = (proj @ p["wp_proj"] + uhot @ p["wp_uh"]
            + prev_i @ p["wp_pi"] + ihot @ p["wp_ih"] + p["bp"])
    newu = jax.nn.sigmoid(prev_u @ p["wu_a"] + prev_i @ p["wu_b"]
                          + ud @ p["wu_d"] + p["bu"])
    newi = jax.nn.sigmoid(prev_i @ p["wi_a"] + prev_u @ p["wi_b"]
                          + idel @ p["wi_d"] + p["bi"])
    return newu, prev_u, newi, pred, prev_i


if __name__ == "__main__":
    # Small, module-consistent shapes (E=64 -> 2E=128 lane-dense slabs, P=128).
    B, E, U, I = 8, 64, 64, 64   # batch, embedding_size, nb_users, nb_items

    key = jax.random.PRNGKey(0)
    key, k_params, k_um, k_im, k_uid, k_iid, k_ud, k_id = jax.random.split(key, 8)

    raw_params = init_params(k_params, E, U, I)
    kparams = pack_params(raw_params)

    # Memories as produced after some interactions (nonzero, non-trivial test).
    user_memory = jax.random.uniform(k_um, (B, U, E), dtype=jnp.float32)
    item_memory = jax.random.uniform(k_im, (B, I, E), dtype=jnp.float32)

    user_ids = jax.random.randint(k_uid, (B,), 0, U, dtype=jnp.int32)
    item_ids = jax.random.randint(k_iid, (B,), 0, I, dtype=jnp.int32)
    user_features = jax.random.uniform(k_ud, (B, 1), dtype=jnp.float32)  # [delta_user]
    item_features = jax.random.uniform(k_id, (B, 1), dtype=jnp.float32)  # [delta_item]

    # References computed BEFORE the kernel call (memories are donated there).
    refs_tight = jax.block_until_ready(reference_packed(
        kparams, user_memory, item_memory,
        user_ids, user_features, item_ids, item_features))
    refs_fp32 = jax.block_until_ready(reference_torch_fp32(
        raw_params, user_memory, item_memory,
        user_ids, user_features, item_ids, item_features))
    expected_new_um = jax.block_until_ready(
        user_memory.at[jnp.arange(B), user_ids, :].set(refs_tight[0]))
    expected_new_im = jax.block_until_ready(
        item_memory.at[jnp.arange(B), item_ids, :].set(refs_tight[2]))

    (newu, prev_u, newi, pred, prev_i), new_um, new_im = jax.block_until_ready(
        jodie_step(kparams, user_memory, item_memory,
                   user_ids, user_features, item_ids, item_features))

    assert pred.shape == (B, I + E)
    assert newu.shape == (B, E) and newi.shape == (B, E)

    got = (newu, prev_u, newi, pred, prev_i)
    # Tight check: kernel vs identical-math JAX mirror.
    for g, w in zip(got, refs_tight):
        assert jnp.allclose(g, w, atol=1e-4, rtol=1e-4)
    # Loose check: kernel vs exact fp32 PyTorch-style forward (bf16 tolerance).
    for g, w in zip(got, refs_fp32):
        assert jnp.allclose(g, w, atol=5e-2, rtol=5e-2)
    # Memory scatter semantics preserved.
    assert jnp.allclose(new_um, expected_new_um, atol=1e-4, rtol=1e-4)
    assert jnp.allclose(new_im, expected_new_im, atol=1e-4, rtol=1e-4)

    print("KERNEL_OK")
</pallas_src>

<mosaic_0001>
module attributes {stable_mosaic.version = 11 : i64} {
  func.func @_jodie_step_kernel(%arg0: i32, %arg1: i32, %arg2: memref<8x128xbf16, #tpu.memory_space<vmem>>, %arg3: memref<8x1xf32, #tpu.memory_space<vmem>>, %arg4: memref<8x1xf32, #tpu.memory_space<vmem>>, %arg5: memref<8x128xbf16, #tpu.memory_space<vmem>>, %arg6: memref<2x128xf32, #tpu.memory_space<vmem>>, %arg7: memref<128x128xbf16, #tpu.memory_space<vmem>>, %arg8: memref<128x128xbf16, #tpu.memory_space<vmem>>, %arg9: memref<2x128xf32, #tpu.memory_space<vmem>>, %arg10: memref<1x128xf32, #tpu.memory_space<vmem>>, %arg11: memref<8x128xf32, #tpu.memory_space<vmem>>, %arg12: memref<8x128xf32, #tpu.memory_space<vmem>>) attributes {dimension_semantics = [#tpu.dimension_semantics<parallel>, #tpu.dimension_semantics<arbitrary>], iteration_bounds = array<i64: 1, 1>, scalar_prefetch = 0 : i64, scratch_operands = 0 : i64, tpu.core_type = #tpu.core_type<tc>, window_params = [{transform_indices = @transform_0, window_bounds = array<i64: 8, 128>}, {transform_indices = @transform_1, window_bounds = array<i64: 8, 1>}, {transform_indices = @transform_2, window_bounds = array<i64: 8, 1>}, {transform_indices = @transform_3, window_bounds = array<i64: 8, 128>}, {pipeline_mode = #tpu.pipeline_mode<synchronous>, transform_indices = @transform_4, window_bounds = array<i64: 2, 128>}, {transform_indices = @transform_5, window_bounds = array<i64: 128, 128>}, {pipeline_mode = #tpu.pipeline_mode<synchronous>, transform_indices = @transform_6, window_bounds = array<i64: 128, 128>}, {pipeline_mode = #tpu.pipeline_mode<synchronous>, transform_indices = @transform_7, window_bounds = array<i64: 2, 128>}, {pipeline_mode = #tpu.pipeline_mode<synchronous>, transform_indices = @transform_8, window_bounds = array<i64: 1, 128>}, {transform_indices = @transform_9, window_bounds = array<i64: 8, 128>}, {transform_indices = @transform_10, window_bounds = array<i64: 8, 128>}]} {
    %c0 = arith.constant 0 : index
    %c0_0 = arith.constant 0 : index
    %0 = vector.load %arg2[%c0, %c0_0] : memref<8x128xbf16, #tpu.memory_space<vmem>>, vector<8x128xbf16>
    %c0_1 = arith.constant 0 : index
    %c0_2 = arith.constant 0 : index
    %1 = vector.load %arg3[%c0_1, %c0_2] : memref<8x1xf32, #tpu.memory_space<vmem>>, vector<8x1xf32>
    %c0_3 = arith.constant 0 : index
    %c0_4 = arith.constant 0 : index
    %2 = vector.load %arg4[%c0_3, %c0_4] : memref<8x1xf32, #tpu.memory_space<vmem>>, vector<8x1xf32>
    %c0_5 = arith.constant 0 : index
    %c0_6 = arith.constant 0 : index
    %3 = vector.load %arg6[%c0_5, %c0_6] : memref<2x128xf32, #tpu.memory_space<vmem>>, vector<1x128xf32>
    %4 = vector.broadcast %1 : vector<8x1xf32> to vector<8x128xf32>
    %5 = vector.broadcast %3 : vector<1x128xf32> to vector<8x128xf32>
    %6 = arith.mulf %4, %5 : vector<8x128xf32>
    %c1 = arith.constant 1 : index
    %c0_7 = arith.constant 0 : index
    %7 = vector.load %arg6[%c1, %c0_7] : memref<2x128xf32, #tpu.memory_space<vmem>>, vector<1x128xf32>
    %8 = vector.broadcast %7 : vector<1x128xf32> to vector<8x128xf32>
    %9 = arith.addf %6, %8 : vector<8x128xf32>
    %cst = arith.constant 1.000000e+00 : f32
    %10 = vector.broadcast %cst : f32 to vector<8x128xf32>
    %11 = arith.addf %10, %9 : vector<8x128xf32>
    %12 = arith.extf %0 : vector<8x128xbf16> to vector<8x128xf32>
    %13 = arith.mulf %11, %12 : vector<8x128xf32>
    %14 = arith.truncf %13 : vector<8x128xf32> to vector<8x128xbf16>
    %c0_8 = arith.constant 0 : index
    %c0_9 = arith.constant 0 : index
    %15 = vector.load %arg7[%c0_8, %c0_9] : memref<128x128xbf16, #tpu.memory_space<vmem>>, vector<128x128xbf16>
    %cst_10 = arith.constant dense<0.000000e+00> : vector<8x128xf32>
    %16 = tpu.matmul %14, %15, %cst_10 {dimension_numbers = #tpu.dot_dimension_numbers<[1], [0], [0], [1], [0, 0, 1, 1], [], []>} : vector<8x128xbf16>, vector<128x128xbf16>, vector<8x128xf32> -> vector<8x128xf32>
    %c0_11 = arith.constant 0 : index
    %c0_12 = arith.constant 0 : index
    %17 = vector.load %arg5[%c0_11, %c0_12] : memref<8x128xbf16, #tpu.memory_space<vmem>>, vector<8x128xbf16>
    %18 = arith.extf %17 : vector<8x128xbf16> to vector<8x128xf32>
    %19 = arith.addf %16, %18 : vector<8x128xf32>
    %c0_13 = arith.constant 0 : index
    %c0_14 = arith.constant 0 : index
    %20 = vector.load %arg11[%c0_13, %c0_14] : memref<8x128xf32, #tpu.memory_space<vmem>>, vector<8x128xf32>
    tpu.vector_store %arg11[%c0_13, %c0_14], %19 {strides = array<i32>} : memref<8x128xf32, #tpu.memory_space<vmem>>, vector<8x128xf32>,
    %c0_i32 = arith.constant 0 : i32
    %21 = arith.cmpi eq, %arg1, %c0_i32 : i32
    %22 = arith.extui %21 : i1 to i32
    %c0_i32_15 = arith.constant 0 : i32
    %23 = arith.cmpi ne, %22, %c0_i32_15 : i32
    scf.if %23 {
      %c0_16 = arith.constant 0 : index
      %c0_17 = arith.constant 0 : index
      %24 = vector.load %arg8[%c0_16, %c0_17] : memref<128x128xbf16, #tpu.memory_space<vmem>>, vector<128x128xbf16>
      %cst_18 = arith.constant dense<0.000000e+00> : vector<8x128xf32>
      %25 = tpu.matmul %0, %24, %cst_18 {dimension_numbers = #tpu.dot_dimension_numbers<[1], [0], [0], [1], [0, 0, 1, 1], [], []>} : vector<8x128xbf16>, vector<128x128xbf16>, vector<8x128xf32> -> vector<8x128xf32>
      %c0_19 = arith.constant 0 : index
      %c0_20 = arith.constant 0 : index
      %26 = vector.load %arg9[%c0_19, %c0_20] : memref<2x128xf32, #tpu.memory_space<vmem>>, vector<1x128xf32>
      %27 = vector.broadcast %1 : vector<8x1xf32> to vector<8x128xf32>
      %28 = vector.broadcast %26 : vector<1x128xf32> to vector<8x128xf32>
      %29 = arith.mulf %27, %28 : vector<8x128xf32>
      %c1_21 = arith.constant 1 : index
      %c0_22 = arith.constant 0 : index
      %30 = vector.load %arg9[%c1_21, %c0_22] : memref<2x128xf32, #tpu.memory_space<vmem>>, vector<1x128xf32>
      %31 = vector.broadcast %2 : vector<8x1xf32> to vector<8x128xf32>
      %32 = vector.broadcast %30 : vector<1x128xf32> to vector<8x128xf32>
      %33 = arith.mulf %31, %32 : vector<8x128xf32>
      %34 = arith.addf %29, %33 : vector<8x128xf32>
      %35 = arith.addf %25, %34 : vector<8x128xf32>
      %c0_23 = arith.constant 0 : index
      %c0_24 = arith.constant 0 : index
      %36 = vector.load %arg10[%c0_23, %c0_24] : memref<1x128xf32, #tpu.memory_space<vmem>>, vector<1x128xf32>
      %37 = vector.broadcast %36 : vector<1x128xf32> to vector<8x128xf32>
      %38 = arith.addf %35, %37 : vector<8x128xf32>
      %39 = arith.negf %38 : vector<8x128xf32>
      %40 = math.exp %39 : vector<8x128xf32>
      %cst_25 = arith.constant 1.000000e+00 : f32
      %41 = vector.broadcast %cst_25 : f32 to vector<8x128xf32>
      %42 = arith.addf %41, %40 : vector<8x128xf32>
      %43 = arith.divf %41, %42 : vector<8x128xf32>
      %c0_26 = arith.constant 0 : index
      %c0_27 = arith.constant 0 : index
      %44 = vector.load %arg12[%c0_26, %c0_27] : memref<8x128xf32, #tpu.memory_space<vmem>>, vector<8x128xf32>
      tpu.vector_store %arg12[%c0_26, %c0_27], %43 {strides = array<i32>} : memref<8x128xf32, #tpu.memory_space<vmem>>, vector<8x128xf32>,
    } else {
    }
    return
  }
  func.func @transform_0(%arg0: i32, %arg1: i32) -> (i32, i32) {
    %c0_i32 = arith.constant 0 : i32
    %c0_i32_0 = arith.constant 0 : i32
    return %arg0, %c0_i32 : i32, i32
  }
  func.func @transform_1(%arg0: i32, %arg1: i32) -> (i32, i32) {
    %c0_i32 = arith.constant 0 : i32
    %c0_i32_0 = arith.constant 0 : i32
    return %arg0, %c0_i32 : i32, i32
  }
  func.func @transform_2(%arg0: i32, %arg1: i32) -> (i32, i32) {
    %c0_i32 = arith.constant 0 : i32
    %c0_i32_0 = arith.constant 0 : i32
    return %arg0, %c0_i32 : i32, i32
  }
  func.func @transform_3(%arg0: i32, %arg1: i32) -> (i32, i32) {
    %c0_i32 = arith.constant 0 : i32
    return %arg0, %arg1 : i32, i32
  }
  func.func @transform_4(%arg0: i32, %arg1: i32) -> (i32, i32) {
    %c0_i32 = arith.constant 0 : i32
    %c0_i32_0 = arith.constant 0 : i32
    %c0_i32_1 = arith.constant 0 : i32
    return %c0_i32, %c0_i32_0 : i32, i32
  }
  func.func @transform_5(%arg0: i32, %arg1: i32) -> (i32, i32) {
    %c0_i32 = arith.constant 0 : i32
    %c0_i32_0 = arith.constant 0 : i32
    return %c0_i32, %arg1 : i32, i32
  }
  func.func @transform_6(%arg0: i32, %arg1: i32) -> (i32, i32) {
    %c0_i32 = arith.constant 0 : i32
    %c0_i32_0 = arith.constant 0 : i32
    %c0_i32_1 = arith.constant 0 : i32
    return %c0_i32, %c0_i32_0 : i32, i32
  }
  func.func @transform_7(%arg0: i32, %arg1: i32) -> (i32, i32) {
    %c0_i32 = arith.constant 0 : i32
    %c0_i32_0 = arith.constant 0 : i32
    %c0_i32_1 = arith.constant 0 : i32
    return %c0_i32, %c0_i32_0 : i32, i32
  }
  func.func @transform_8(%arg0: i32, %arg1: i32) -> (i32, i32) {
    %c0_i32 = arith.constant 0 : i32
    %c0_i32_0 = arith.constant 0 : i32
    %c0_i32_1 = arith.constant 0 : i32
    return %c0_i32, %c0_i32_0 : i32, i32
  }
  func.func @transform_9(%arg0: i32, %arg1: i32) -> (i32, i32) {
    %c0_i32 = arith.constant 0 : i32
    return %arg0, %arg1 : i32, i32
  }
  func.func @transform_10(%arg0: i32, %arg1: i32) -> (i32, i32) {
    %c0_i32 = arith.constant 0 : i32
    %c0_i32_0 = arith.constant 0 : i32
    return %arg0, %c0_i32 : i32, i32
  }
}

</mosaic_0001>

<bundles_post_ra>
// kernel: jodie_forward_edge_sequence.1
= control target key start
LH: loop header
LB: loop body
LE: loop exit
PB: predicated region body
PF: predicated region fallthrough
CT: control target
= control target key end

     0   :  { %v455_v2 = vmov 0   ;;  %v456_v3 = vmov 0.0   ;;  %vm457_vm0 = vmmov 0   ;;  %s604_s0 = inlined_call_operand.vmem [shape: bf16[8,128], index: 0, kind: input, shape index: {}]   ;;  %s605_s1 = inlined_call_operand.vmem [shape: f32[8,1], index: 1, kind: input, shape index: {}]   ;;  %s606_s2 = inlined_call_operand.vmem [shape: f32[8,1], index: 2, kind: input, shape index: {}]   ;;  %s607_s3 = inlined_call_operand.vmem [shape: bf16[8,128], index: 3, kind: input, shape index: {}]   ;;  %s608_s4 = inlined_call_operand.vmem [shape: f32[2,128], index: 4, kind: input, shape index: {}]   ;;  %s609_s5 = inlined_call_operand.vmem [shape: bf16[128,128], index: 5, kind: input, shape index: {}]   ;;  %s610_s6 = inlined_call_operand.vmem [shape: bf16[128,128], index: 6, kind: input, shape index: {}]   ;;  %s611_s7 = inlined_call_operand.vmem [shape: f32[2,128], index: 7, kind: input, shape index: {}]   ;;  %s612_s8 = inlined_call_operand.vmem [shape: f32[1,128], index: 8, kind: input, shape index: {}]   ;;  %s613_s9 = inlined_call_operand.hbm [shape: f32[8,128], index: 9, kind: output, shape index: {0}]   ;;  %s614_s10 = inlined_call_operand.vmem [shape: f32[8,128], index: 10, kind: output, shape index: {1}]  }
   0x1   :  { %v37_v0 = vld [vmem:[%s605_s1] sm:$0xff]  ;;  %410 = vset.pattern.permute.xlu0 %v455_v2  ;;  %386 = vmatprep.subr.bf16.mxu1 %v456_v3  ;;  %v412_v4 = vld [vmem:[%s610_s6 + $0x8] sm:$0xff]   ;;  %v413_v6 = vld [vmem:[%s610_s6 + $0x10] sm:$0xff]  }
   0x2   :  { %v411_v1 = vld [vmem:[%s610_s6] sm:$0xff]   ;;  %42 = vperm.xlu0 %410, %v37_v0   ;;  %402 = vmatprep.mubr.msk.bf16.mxu1 %vm457_vm0, %v456_v3  ;;  %v414_v8 = vld [vmem:[%s610_s6 + $0x18] sm:$0xff]   ;;  %v420_v9 = vld [vmem:[%s609_s5 + $0x8] sm:$0xff]  }
   0x3   :  { %387 = vmatpush3.bf16.msra.mxu1 %v411_v1  ;;  %v38_v5 = vld [vmem:[%s606_s2] sm:$0xff]  ;;  %366 = vmatprep.subr.bf16.mxu0 %v456_v3  ;;  %v421_v11 = vld [vmem:[%s609_s5 + $0x10] sm:$0xff]   ;;  %v416_v12 = vld [vmem:[%s610_s6 + $0x28] sm:$0xff]  }
   0x4   :  { %388 = vmatprep.subr.bf16.mxu1 %v456_v3  ;;  %382 = vmatprep.mubr.msk.bf16.mxu0 %vm457_vm0, %v456_v3  ;;  %v419_v7 = vld [vmem:[%s609_s5] sm:$0xff]  }
   0x5   :  { %367 = vmatpush3.bf16.msra.mxu0 %v419_v7  ;;  %v415_v10 = vld [vmem:[%s610_s6 + $0x20] sm:$0xff]  }
   0x6   :  { %196 = vperm.xlu0 %410, %v38_v5   ;;  %368 = vmatprep.subr.bf16.mxu0 %v456_v3 }
   0x7   :  { %389 = vmatpush3.bf16.msra.mxu1 %v412_v4 }
   0x8   :  { %390 = vmatprep.subr.bf16.mxu1 %v456_v3 }
   0x9   :  { %369 = vmatpush3.bf16.msra.mxu0 %v420_v9 }
   0xa   :  { %370 = vmatprep.subr.bf16.mxu0 %v456_v3 }
   0xb   :  { %391 = vmatpush3.bf16.msra.mxu1 %v413_v6 }
   0xc   :  { %392 = vmatprep.subr.bf16.mxu1 %v456_v3 }
   0xf   :  { %393 = vmatpush3.bf16.msra.mxu1 %v414_v8 }
  0x10   :  { %394 = vmatprep.subr.bf16.mxu1 %v456_v3 }
  0x13   :  { %395 = vmatpush3.bf16.msra.mxu1 %v415_v10 }
  0x14   :  { %16 = vsyncpa [#allocation3], 0  ;;  %396 = vmatprep.subr.bf16.mxu1 %v456_v3  ;;  %371 = vmatpush3.bf16.msra.mxu0 %v421_v11  ;;  %v422_v13 = vld [vmem:[%s609_s5 + $0x18] sm:$0xff]   ;;  %v417_v14 = vld [vmem:[%s610_s6 + $0x30] sm:$0xff]  }
  0x15   :  { %372 = vmatprep.subr.bf16.mxu0 %v456_v3  ;;  %v423_v15 = vld [vmem:[%s609_s5 + $0x20] sm:$0xff]   ;;  %v418_v16 = vld [vmem:[%s610_s6 + $0x38] sm:$0xff]   ;;  %v424_v17 = vld [vmem:[%s609_s5 + $0x28] sm:$0xff]  }
  0x16   :  { %v36_v18 = vld [vmem:[%s604_s0] sm:$0xf]  ;;  %v425_v19 = vld [vmem:[%s609_s5 + $0x30] sm:$0xff]   ;;  %v426_v20 = vld [vmem:[%s609_s5 + $0x38] sm:$0xff]  }
  0x17   :  { %397 = vmatpush3.bf16.msra.mxu1 %v416_v12  ;;  %v326_v21 = vld [vmem:[%s608_s4] ss:$0 sm:$0xff]  ;;  %v327_v22 = vld [vmem:[%s608_s4 + $0x1] ss:$0 sm:$0xff]  ;;  %v57_v25 = vunpack.c.l.bf16 %v36_v18 }
  0x18   :  { %398 = vmatprep.subr.bf16.mxu1 %v456_v3  ;;  %373 = vmatpush3.bf16.msra.mxu0 %v422_v13  ;;  %v337_v30 = vld [vmem:[%s611_s7 + $0x1] ss:$0 sm:$0xff]  ;;  %v336_v32 = vld [vmem:[%s611_s7] ss:$0 sm:$0xff] }
  0x19   :  { %374 = vmatprep.subr.bf16.mxu0 %v456_v3  ;;  %v346_v37 = vld [vmem:[%s612_s8] ss:$0 sm:$0xff]  ;;  %s458_s8 = smov [#allocation2]  }
  0x1a   :  { %v76_v47 = vld [vmem:[%s607_s3] sm:$0xf]  ;;  %s314_s16 = sshll.u32 %s458_s8, 4  ;;  %s315_s16 = int_to_ptr.vmem [resolvable:$true] %s314_s16 }
  0x1b   :  { %399 = vmatpush3.bf16.msra.mxu1 %v417_v14  ;;  %v77_v48 = vunpack.c.l.bf16 %v76_v47  ;;  %s431_s17 = scalar_lea.vmem %s315_s16, 128  ;;  %p436_p1 = scmp.lt.s32.totalorder %s315_s16, %s315_s16 }
  0x1c   :  { %400 = vmatprep.subr.bf16.mxu1 %v456_v3  ;;  %375 = vmatpush3.bf16.msra.mxu0 %v423_v15  ;;  %p432_p0 = scmp.ne.s32.totalorder %s315_s16, %s431_s17  ;;  %p437_p2 = scmp.lt.s32.totalorder %s431_s17, %s431_s17 }
  0x1d   :  { %376 = vmatprep.subr.bf16.mxu0 %v456_v3 }
  0x1e   :  { %p438_p3 = por %p437_p2, %p436_p1 }
  0x1f   :  { %401 = vmatpush3.bf16.msra.mxu1 %v418_v16 }
  0x20   :  { %377 = vmatpush3.bf16.msra.mxu0 %v424_v17  ;;  %p439_p4 = pnand %p438_p3, %p432_p0 }
  0x21   :  { %378 = vmatprep.subr.bf16.mxu0 %v456_v3 }
  0x22   :  { %403 = vmatmul.mubr.bf16.vlgmr.msra.gmra.mrb[0].mxu1 %v36_v18 }
  0x24   :  { %379 = vmatpush3.bf16.msra.mxu0 %v425_v19 }
  0x25   :  { %380 = vmatprep.subr.bf16.mxu0 %v456_v3 }
  0x28   :  { %381 = vmatpush3.bf16.msra.mxu0 %v426_v20 }
  0x81   :  { %v43_v23 = vpop.permute.xlu0 %42 }
  0x82   :  { %v49_v24 = vmul.f32 %v326_v21, %v43_v23  ;;  %v192_v34 = vmul.f32 %v336_v32, %v43_v23 }
  0x84   :  { %v55_v26 = vadd.f32 %v327_v22, %v49_v24 }
  0x85   :  { %v197_v31 = vpop.permute.xlu0 %196 }
  0x86   :  { %v56_v27 = vadd.f32 1.0, %v55_v26  ;;  %v203_v33 = vmul.f32 %v337_v30, %v197_v31 }
  0x88   :  { %v58_v28 = vmul.f32 %v57_v25, %v56_v27  ;;  %v204_v35 = vadd.f32 %v203_v33, %v192_v34 }
  0x8a   :  { %v59_v29 = vpack.c.bf16 %v58_v28, %v58_v28 }
  0x8c   :  { %383 = vmatmul.mubr.bf16.vlgmr.msra.gmra.mrb[0].mxu0 %v59_v29 }
  0xf5   :  { %v287_v36 = vpop.f32.mrb[0].mxu1 }
  0xf6   :  { %v288_v38 = vadd.f32 %v287_v36, %v204_v35  ;;  %v404_v39 = vpop.f32.mrb[1].mxu1 }
  0xf7   :  { %v290_v40 = vpop.f32.mrb[2].mxu1 }
  0xf8   :  { %v300_v41 = vadd.f32 %v346_v37, %v288_v38  ;;  %v405_v42 = vpop.f32.mrb[3].mxu1 }
  0xfa   :  { %v347_v43 = vmul.f32 -1.442695, %v300_v41 }
  0xfc   :  { %427 = vpow2.f32 %v347_v43 }
 0x106   :  { %v428_v44 = vpop.eup %427 }
 0x107   :  { %v304_v45 = vadd.f32 1.0, %v428_v44 }
 0x109   :  { %429 = vrcp.f32 %v304_v45 }
 0x113   :  { %v430_v46 = vpop.eup %429 }
 0x114   :  { %307 = vst [vmem:[%s614_s10] sm:$0xff] %v430_v46 }
 0x15f   :  { %v160_v49 = vpop.f32.mrb[0].mxu0 }
 0x160   :  { %v161_v50 = vadd.f32 %v160_v49, %v77_v48  ;;  %v384_v51 = vpop.f32.mrb[1].mxu0 }
 0x161   :  { %v163_v52 = vpop.f32.mrb[2].mxu0 }
 0x162   :  { %166 = vst [vmem:[#allocation2] sm:$0xff] %v161_v50  ;;  %v385_v53 = vpop.f32.mrb[3].mxu0 }
 0x163   :  { %442 = shalt.err (!%p439_p4)
}
 0x164   :  { %s443_s3 = scalar_lea.hbm %s613_s9, 128 }
 0x165   :  { %p444_p5 = scmp.ne.s32.totalorder %s613_s9, %s443_s3  ;;  %p447_p6 = scmp.lt.u32.totalorder %s443_s3, %s613_s9 }
 0x167   :  { %p449_p7 = pnand %p447_p6, %p444_p5 }
 0x169   :  { %452 = shalt.err (!%p449_p7)
}
 0x16a   :  { %317 = dma.vmem_to_hbm [thread:$0]  %s315_s16, 128, %s613_s9, [#allocation3]  }
 0x16b   :  { %453 = dma.done.wait [#allocation3], 128  }
 0x16c   :  { %454 = vsyncadd [#allocation3], 4294967168 }
 0x16d   :  { %325 = vsyncpa [#allocation3], 1 }

</bundles_post_ra>
